<compile_context>
chip_gen: v7x
topology: tpu7x:2x2x1
jax: 0.10.0
libtpu: 0.0.40
codegen_flags: <defaults>
</compile_context>

<pallas_src>
import functools

import jax
import jax.numpy as jnp
from jax.experimental import pallas as pl
from jax.experimental.pallas import tpu as pltpu

_SMALL_ROWS = 256                      # <= this many rows -> single-block path
_TARGET_TILE_BYTES = 6 * 1024 * 1024   # ~constant bytes per grid step
_VMEM_LIMIT_BYTES = 40 * 1024 * 1024   # 2x(in+out) tiles + headroom (< v7x 64 MiB)


def _h_sigmoid_kernel(x_ref, o_ref, *, scale):
    # ReLU6(x + 3) * (h_max / 6) — pure VPU elementwise work.
    x = x_ref[...]
    o_ref[...] = (jnp.clip(x + 3.0, 0.0, 6.0) * scale).astype(o_ref.dtype)


def _pick_lane(n):
    """Largest lane width 128*g (g <= 16) that divides n; 0 if n % 128 != 0."""
    if n % 128 != 0:
        return 0
    m = n // 128
    for g in range(16, 0, -1):
        if m % g == 0:
            return 128 * g
    return 128


def _run_2d(x2d, scale):
    """Run the kernel over a lane-dense (rows, lane) view (lane % 128 == 0)."""
    rows, lane = x2d.shape
    dtype = x2d.dtype
    kernel = functools.partial(_h_sigmoid_kernel, scale=scale)

    if rows <= _SMALL_ROWS:
        # Tiny activation: one full-extent block (block shape == array shape
        # is always legal); no grid machinery / pipelining overhead needed.
        return pl.pallas_call(
            kernel,
            out_shape=jax.ShapeDtypeStruct((rows, lane), dtype),
            in_specs=[pl.BlockSpec((rows, lane), lambda: (0, 0))],
            out_specs=pl.BlockSpec((rows, lane), lambda: (0, 0)),
        )(x2d)

    # Tiled, software-pipelined path: constant bytes per step across dtypes.
    itemsize = dtype.itemsize
    tile_rows = _TARGET_TILE_BYTES // (lane * itemsize)
    tile_rows = min(tile_rows, max(_SMALL_ROWS, rows // 4))  # keep >= ~4 steps
    tile_rows = max(32, (tile_rows // 32) * 32)              # sublane packing safe

    grid = (pl.cdiv(rows, tile_rows),)
    return pl.pallas_call(
        kernel,
        out_shape=jax.ShapeDtypeStruct((rows, lane), dtype),
        grid=grid,
        in_specs=[pl.BlockSpec((tile_rows, lane), lambda i: (i, 0))],
        out_specs=pl.BlockSpec((tile_rows, lane), lambda i: (i, 0)),
        compiler_params=pltpu.CompilerParams(
            dimension_semantics=("parallel",),
            vmem_limit_bytes=_VMEM_LIMIT_BYTES,
        ),
    )(x2d)


def h_sigmoid(x, h_max=1.0):
    """Elementwise hard-sigmoid: relu6(x + 3) * h_max / 6 (same shape/dtype)."""
    if x.size == 0:
        # A zero-sized block would not lower; nothing to compute.
        return x

    orig_shape, orig_dtype = x.shape, x.dtype
    # h_max is a module-construction-time Python constant in the reference.
    scale = float(h_max) / 6.0
    n = x.size
    flat = x.reshape(-1)  # free metadata change for a contiguous array

    lane = _pick_lane(n)
    if lane:
        out2d = _run_2d(flat.reshape(n // lane, lane), scale)
        return out2d.reshape(orig_shape)

    # Ragged flat size (n % 128 != 0): kernel on the 128-aligned bulk, plain
    # jnp on the <128-element tail — avoids a padded copy of the whole tensor.
    bulk = (n // 128) * 128
    tail = flat[bulk:]
    tail_out = (jnp.clip(tail + 3.0, 0.0, 6.0) * scale).astype(orig_dtype)
    if bulk == 0:
        return tail_out.reshape(orig_shape)
    bulk_lane = _pick_lane(bulk)
    head_out = _run_2d(flat[:bulk].reshape(bulk // bulk_lane, bulk_lane), scale)
    return jnp.concatenate([head_out.reshape(-1), tail_out]).reshape(orig_shape)


def _reference(x, h_max=1.0):
    return jnp.clip(x + 3.0, 0.0, 6.0) * (float(h_max) / 6.0)


if __name__ == "__main__":
    key = jax.random.PRNGKey(0)
    k1, k2, k3 = jax.random.split(key, 3)

    # 1) Small NCHW activation consistent with the conv-style module
    #    (single full-extent block fast path).
    x_small = jax.random.normal(k1, (2, 4, 16, 16), dtype=jnp.float32) * 4.0
    out_small = jax.block_until_ready(h_sigmoid(x_small, h_max=1.0))
    assert out_small.shape == x_small.shape and out_small.dtype == x_small.dtype
    assert jnp.allclose(out_small, _reference(x_small, 1.0), atol=1e-6)

    # 2) Ragged flat size (n % 128 != 0): 128-aligned bulk through the kernel,
    #    <128-element tail in plain jnp; non-default h_max.
    x_ragged = jax.random.normal(k2, (2, 3, 7, 7), dtype=jnp.float32) * 4.0
    out_ragged = jax.block_until_ready(h_sigmoid(x_ragged, h_max=2.0))
    assert out_ragged.shape == x_ragged.shape
    assert jnp.allclose(out_ragged, _reference(x_ragged, 2.0), atol=1e-6)

    # 3) Mid-size activation exercising the gridded, pipelined path
    #    (rows > 256, partial last grid block).
    x_mid = jax.random.normal(k3, (4, 32, 72, 72), dtype=jnp.float32) * 4.0
    out_mid = jax.block_until_ready(h_sigmoid(x_mid, h_max=1.0))
    assert out_mid.shape == x_mid.shape and out_mid.dtype == x_mid.dtype
    assert jnp.allclose(out_mid, _reference(x_mid, 1.0), atol=1e-6)

    print("KERNEL_OK")
</pallas_src>

<mosaic_0001>
module attributes {stable_mosaic.version = 11 : i64} {
  func.func @_h_sigmoid_kernel(%arg0: memref<1x2048xf32, #tpu.memory_space<vmem>>, %arg1: memref<1x2048xf32, #tpu.memory_space<vmem>>) attributes {dimension_semantics = [], scalar_prefetch = 0 : i64, scratch_operands = 0 : i64, tpu.core_type = #tpu.core_type<tc>} {
    %c0 = arith.constant 0 : index
    %c0_0 = arith.constant 0 : index
    %0 = vector.load %arg0[%c0, %c0_0] : memref<1x2048xf32, #tpu.memory_space<vmem>>, vector<1x2048xf32>
    %cst = arith.constant 3.000000e+00 : f32
    %1 = vector.broadcast %cst : f32 to vector<1x2048xf32>
    %2 = arith.addf %0, %1 : vector<1x2048xf32>
    %cst_1 = arith.constant 0.000000e+00 : f32
    %cst_2 = arith.constant 6.000000e+00 : f32
    %3 = vector.broadcast %cst_1 : f32 to vector<1x2048xf32>
    %4 = arith.maximumf %3, %2 : vector<1x2048xf32>
    %5 = vector.broadcast %cst_2 : f32 to vector<1x2048xf32>
    %6 = arith.minimumf %5, %4 : vector<1x2048xf32>
    %cst_3 = arith.constant 0.166666672 : f32
    %7 = vector.broadcast %cst_3 : f32 to vector<1x2048xf32>
    %8 = arith.mulf %6, %7 : vector<1x2048xf32>
    %c0_4 = arith.constant 0 : index
    %c0_5 = arith.constant 0 : index
    %9 = vector.load %arg1[%c0_4, %c0_5] : memref<1x2048xf32, #tpu.memory_space<vmem>>, vector<1x2048xf32>
    tpu.vector_store %arg1[%c0_4, %c0_5], %8 {strides = array<i32>} : memref<1x2048xf32, #tpu.memory_space<vmem>>, vector<1x2048xf32>,
    return
  }
}

</mosaic_0001>

<bundles_post_ra>
// kernel: tpu_custom_call.1
= control target key start
LH: loop header
LB: loop body
LE: loop exit
PB: predicated region body
PF: predicated region fallthrough
CT: control target
= control target key end

     0   :  { %6 = vsyncpa [#allocation3], 0  ;;  %s134_s0 = inlined_call_operand.hbm [shape: f32[1,2048], index: 0, kind: input, shape index: {}]   ;;  %s135_s1 = inlined_call_operand.hbm [shape: f32[1,2048], index: 1, kind: output, shape index: {}]  }
   0x1   :  { %7 = vsyncpa [#allocation4], 0  ;;  %s98_s6 = smov [#allocation2]   ;;  %s50_s10 = scalar_lea.hbm %s134_s0, 256 }
   0x2   :  { %s14_s7 = sshll.u32 %s98_s6, 4  ;;  %p51_p0 = scmp.ne.s32.totalorder %s134_s0, %s50_s10  ;;  %s15_s7 = int_to_ptr.vmem [resolvable:$true] %s14_s7 }
   0x3   :  { %p54_p1 = scmp.lt.u32.totalorder %s50_s10, %s134_s0 }
   0x5   :  { %p56_p2 = pnand %p54_p1, %p51_p0 }
   0x7   :  { %59 = shalt.err (!%p56_p2)
}
   0x8   :  { %s60_s15 = scalar_lea.vmem %s15_s7, 256  ;;  %p65_p4 = scmp.lt.s32.totalorder %s15_s7, %s15_s7 }
   0x9   :  { %p61_p3 = scmp.ne.s32.totalorder %s15_s7, %s60_s15  ;;  %p66_p5 = scmp.lt.s32.totalorder %s60_s15, %s60_s15 }
   0xb   :  { %p67_p6 = por %p66_p5, %p65_p4 }
   0xd   :  { %p68_p7 = pnand %p67_p6, %p61_p3 }
   0xf   :  { %71 = shalt.err (!%p68_p7)
}
  0x10   :  { %17 = dma.hbm_to_vmem [thread:$0]  %s134_s0, 256, %s15_s7, [#allocation3]  }
  0x11   :  { %94 = dma.done.wait [#allocation3], 256  }
  0x12   :  { %95 = vsyncadd [#allocation3], 4294967040  ;;  %v21_v0 = vld [vmem:[#allocation2] sm:$0xff]  ;;  %v22_v1 = vld [vmem:[#allocation2 + $0x8] sm:$0xff]  ;;  %s99_s18 = smov [#allocation5]  }
  0x13   :  { %v23_v2 = vadd.f32 3.0, %v21_v0  ;;  %v24_v3 = vadd.f32 3.0, %v22_v1  ;;  %s39_s19 = sshll.u32 %s99_s18, 4  ;;  %s40_s19 = int_to_ptr.vmem [resolvable:$true] %s39_s19 }
  0x14   :  { %s72_s20 = scalar_lea.vmem %s40_s19, 256  ;;  %p77_p9 = scmp.lt.s32.totalorder %s40_s19, %s40_s19 }
  0x15   :  { %v25_v4 = vmax.f32 %v23_v2, 0.0  ;;  %v26_v5 = vmax.f32 %v24_v3, 0.0  ;;  %p73_p8 = scmp.ne.s32.totalorder %s40_s19, %s72_s20  ;;  %p78_p10 = scmp.lt.s32.totalorder %s72_s20, %s72_s20 }
  0x17   :  { %v27_v6 = vmin.f32 %v25_v4, 6.0  ;;  %v28_v7 = vmin.f32 %v26_v5, 6.0  ;;  %p79_p11 = por %p78_p10, %p77_p9 }
  0x19   :  { %v29_v8 = vmul.f32 0.16666667, %v27_v6  ;;  %v30_v9 = vmul.f32 0.16666667, %v28_v7  ;;  %p80_p12 = pnand %p79_p11, %p73_p8 }
  0x1b   :  { %31 = vst [vmem:[#allocation5] sm:$0xff] %v29_v8  ;;  %32 = vst [vmem:[#allocation5 + $0x8] sm:$0xff] %v30_v9 }
  0x1c   :  { %83 = shalt.err (!%p80_p12)
}
  0x1d   :  { %s84_s22 = scalar_lea.hbm %s135_s1, 256 }
  0x1e   :  { %p85_p13 = scmp.ne.s32.totalorder %s135_s1, %s84_s22  ;;  %p88_p0 = scmp.lt.u32.totalorder %s84_s22, %s135_s1 }
  0x20   :  { %p90_p1 = pnand %p88_p0, %p85_p13 }
  0x22   :  { %93 = shalt.err (!%p90_p1)
}
  0x23   :  { %42 = dma.vmem_to_hbm [thread:$0]  %s40_s19, 256, %s135_s1, [#allocation4]  }
  0x24   :  { %96 = dma.done.wait [#allocation4], 256  }
  0x25   :  { %97 = vsyncadd [#allocation4], 4294967040 }
  0x26   :  { %46 = vsyncpa [#allocation3], 1 }
  0x27   :  { %47 = vsyncpa [#allocation4], 1 }

</bundles_post_ra>
